<compile_context>
chip_gen: v7x
topology: tpu7x:2x2x1
jax: 0.10.0
libtpu: 0.0.40
codegen_flags: <defaults>
</compile_context>

<pallas_src>
import jax
import jax.numpy as jnp
from jax.experimental import pallas as pl
from jax.experimental.pallas import tpu as pltpu

_EPS = 1e-6
_LANES = 128
_MAX_TR = 512                       # row tile cap: fits VMEM on v5e/v6e/v7x
_VMEM_LIMIT = 32 * 1024 * 1024      # explicit scoped-VMEM budget (safe on all gens)


# ----------------------------------------------------------------------------
# Layout helpers: flatten a per-channel map to lane-dense (rows, 128), padded
# with zeros so masked sums are unaffected.
# ----------------------------------------------------------------------------
def _row_tile(total_elems):
    rows = int(pl.cdiv(total_elems, _LANES))
    return int(min(_MAX_TR, pl.cdiv(rows, 8) * 8))


def _flatten_pad(x, tr):
    x = x.reshape(-1)
    t = x.shape[0]
    block = tr * _LANES
    tp = int(pl.cdiv(t, block)) * block
    if tp != t:
        x = jnp.pad(x, (0, tp - t))
    return x.reshape(tp // _LANES, _LANES)


def _flatten_pad_multi(x, tr):
    c = x.shape[0]
    x = x.reshape(c, -1)
    t = x.shape[1]
    block = tr * _LANES
    tp = int(pl.cdiv(t, block)) * block
    if tp != t:
        x = jnp.pad(x, ((0, 0), (0, tp - t)))
    return x.reshape(c, tp // _LANES, _LANES)


# ----------------------------------------------------------------------------
# Kernel A: channel-0 fused balanced-BCE statistics + dice sums.
#   outputs: per-pixel negative BCE map (for OHEM top-k in JAX) and a resident
#   (5, tr, 128) accumulator slab:
#     [0] sum(bce * gt * mask)   positive BCE loss
#     [1] sum(gt * mask)         positive count  (== dice gsum)
#     [2] sum(mask)              mask count      (-> negative count)
#     [3] sum(p * gt * mask)     dice intersection
#     [4] sum(p * mask)          dice pred sum
# ----------------------------------------------------------------------------
def _bce_dice_kernel(pred_ref, gt_ref, mask_ref, neg_ref, acc_ref):
    @pl.when(pl.program_id(1) == 0)
    def _init():
        acc_ref[...] = jnp.zeros_like(acc_ref)

    p = pred_ref[...].astype(jnp.float32)
    g = gt_ref[...].astype(jnp.float32)
    m = mask_ref[...].astype(jnp.float32)

    pc = jnp.clip(p, _EPS, 1.0 - _EPS)
    # gt is binary {0,1} -> single-log BCE.
    bce = -jnp.log(jnp.where(g > 0.5, pc, 1.0 - pc))

    pos = g * m
    neg = m - pos                               # (1 - g) * mask for binary g
    neg_ref[...] = (bce * neg).astype(neg_ref.dtype)

    acc_ref[0] += bce * pos
    acc_ref[1] += pos
    acc_ref[2] += m
    acc_ref[3] += p * pos
    acc_ref[4] += p * m


def _bce_dice_ch0(pred, gt, mask):
    """pred/gt/mask: (N, H, W) -> (neg_loss_map (rows,128), sums (5,))."""
    tr = _row_tile(mask.size)
    predf = _flatten_pad(pred, tr)
    gtf = _flatten_pad(gt, tr)
    maskf = _flatten_pad(mask, tr)
    rp = predf.shape[0]
    n_tiles = rp // tr
    par = 2 if (n_tiles % 2 == 0 and n_tiles >= 2) else 1   # megacore row split (v7x)
    n_inner = n_tiles // par

    row_spec = pl.BlockSpec((tr, _LANES), lambda p, i: (p * n_inner + i, 0))
    acc_spec = pl.BlockSpec((None, 5, tr, _LANES), lambda p, i: (p, 0, 0, 0))

    neg_map, acc = pl.pallas_call(
        _bce_dice_kernel,
        out_shape=(jax.ShapeDtypeStruct((rp, _LANES), jnp.float32),
                   jax.ShapeDtypeStruct((par, 5, tr, _LANES), jnp.float32)),
        grid_spec=pltpu.PrefetchScalarGridSpec(
            num_scalar_prefetch=0,
            grid=(par, n_inner),
            in_specs=[row_spec, row_spec, row_spec],
            out_specs=(row_spec, acc_spec)),
        compiler_params=pltpu.CompilerParams(
            dimension_semantics=("parallel", "arbitrary"),
            vmem_limit_bytes=_VMEM_LIMIT),
    )(predf, gtf, maskf)
    return neg_map, acc.sum(axis=(0, 2, 3))


# ----------------------------------------------------------------------------
# Kernel B: dice sums for a stack of channels (fused single launch).
#   per channel: [0] sum(p*g*m) intersection, [1] sum((p+g)*m) union.
# ----------------------------------------------------------------------------
def _dice_kernel(pred_ref, gt_ref, mask_ref, acc_ref):
    @pl.when(pl.program_id(1) == 0)
    def _init():
        acc_ref[...] = jnp.zeros_like(acc_ref)

    p = pred_ref[...].astype(jnp.float32)
    g = gt_ref[...].astype(jnp.float32)
    m = mask_ref[...].astype(jnp.float32)

    acc_ref[0] += p * g * m
    acc_ref[1] += (p + g) * m


def _dice_partials(preds, gts, mask):
    """preds/gts: (C, N, H, W); mask: (N, H, W) -> (C, 2) [intersection, union]."""
    c = preds.shape[0]
    tr = _row_tile(mask.size)
    predf = _flatten_pad_multi(preds, tr)
    gtf = _flatten_pad_multi(gts, tr)
    maskf = _flatten_pad(mask, tr)
    rp = maskf.shape[0]
    n_tiles = rp // tr

    chan_spec = pl.BlockSpec((None, tr, _LANES), lambda ci, i: (ci, i, 0))
    mask_spec = pl.BlockSpec((tr, _LANES), lambda ci, i: (i, 0))
    acc_spec = pl.BlockSpec((None, 2, tr, _LANES), lambda ci, i: (ci, 0, 0, 0))

    acc = pl.pallas_call(
        _dice_kernel,
        out_shape=jax.ShapeDtypeStruct((c, 2, tr, _LANES), jnp.float32),
        grid_spec=pltpu.PrefetchScalarGridSpec(
            num_scalar_prefetch=0,
            grid=(c, n_tiles),
            in_specs=[chan_spec, chan_spec, mask_spec],
            out_specs=acc_spec),
        compiler_params=pltpu.CompilerParams(
            dimension_semantics=("parallel", "arbitrary"),
            vmem_limit_bytes=_VMEM_LIMIT),
    )(predf, gtf, maskf)
    return acc.sum(axis=(2, 3))


# ----------------------------------------------------------------------------
# OHEM balanced BCE finalization (plain JAX; global top-k over the negative map)
# ----------------------------------------------------------------------------
def _balanced_bce_from_parts(neg_map, pos_loss, pos_cnt, mask_sum, ratio, eps):
    pos_cnt = jnp.round(pos_cnt)                       # integral (binary gt*mask)
    neg_total = jnp.round(mask_sum - pos_cnt)
    neg_cnt = jnp.minimum(neg_total, jnp.floor(pos_cnt * ratio))
    neg_sorted = jnp.sort(neg_map.reshape(-1))[::-1]   # descending
    idx = jnp.arange(neg_sorted.shape[0], dtype=jnp.float32)
    neg_loss = jnp.sum(jnp.where(idx < neg_cnt, neg_sorted, 0.0))
    return (pos_loss + neg_loss) / (pos_cnt + neg_cnt + eps)


# ----------------------------------------------------------------------------
# Loss modules
# ----------------------------------------------------------------------------
class DiceLoss:
    """dice_loss.DiceLoss: 1 - 2*sum(p*g*m) / (sum(p*m) + sum(g*m) + eps)."""

    def __init__(self, eps=1e-6):
        self.eps = eps

    def __call__(self, pred, gt, mask, weights=None):
        if pred.ndim == 4:
            pred = pred[:, 0]
        if gt.ndim == 4:
            gt = gt[:, 0]
        if weights is not None:
            mask = weights * mask
        sums = _dice_partials(pred[None], gt[None], mask)[0]
        return 1.0 - 2.0 * sums[0] / (sums[1] + self.eps)


class BalanceCrossEntropyLoss:
    """Balanced BCE with hard-negative mining (negative_ratio * positives)."""

    def __init__(self, negative_ratio=3.0, eps=1e-6):
        self.negative_ratio = negative_ratio
        self.eps = eps

    def __call__(self, pred, gt, mask):
        if pred.ndim == 4:
            pred = pred[:, 0]
        if gt.ndim == 4:
            gt = gt[:, 0]
        neg_map, s = _bce_dice_ch0(pred, gt, mask)
        return _balanced_bce_from_parts(neg_map, s[0], s[1], s[2],
                                        self.negative_ratio, self.eps)


class DiceLossModule:
    """Top-level DiceLoss nn.Module (DiceLoss on `binary`)."""

    def __init__(self, eps=1e-6):
        self.loss = DiceLoss(eps)

    def __call__(self, pred, batch, **kwargs):
        loss = self.loss(pred['binary'], batch['gt'], batch['mask'])
        return loss, dict(dice_loss=loss)


class L1BalanceSegLoss:
    """Balanced CrossEntropy on `binary`[:,0], DiceLoss on every channel."""

    def __init__(self, eps=1e-6, bce_scale=5, dice_scale=1):
        self.eps = eps
        self.bce_scale = bce_scale
        self.dice_scale = dice_scale
        self.negative_ratio = 3.0
        self.dice_loss = DiceLoss(eps=eps)
        self.bce_loss = BalanceCrossEntropyLoss(eps=eps)

    def forward(self, pred, batch, **kwargs):
        binary = pred['binary']                    # (N, C, H, W)
        gt = batch['gt']
        mask = batch['mask']                       # (N, H, W)
        gt0 = gt[:, 0] if gt.ndim == 4 else gt

        # Channel 0: one fused Pallas pass gives BCE stats + dice sums.
        neg_map, s = _bce_dice_ch0(binary[:, 0], gt0, mask)
        pos_loss, pos_cnt, mask_sum, inter0, psum0 = s[0], s[1], s[2], s[3], s[4]
        bce_loss = _balanced_bce_from_parts(neg_map, pos_loss, pos_cnt, mask_sum,
                                            self.negative_ratio, self.eps)
        dice_loss = 1.0 - 2.0 * inter0 / (psum0 + pos_cnt + self.eps)

        metrics = dict(bce_loss=bce_loss)
        c = binary.shape[1]
        if c > 1:
            seg_gts = batch['seg_gts']             # (N, >=C-1, H, W)
            preds_rest = jnp.transpose(binary[:, 1:c], (1, 0, 2, 3))      # (C-1, N, H, W)
            gts_rest = jnp.transpose(seg_gts[:, :c - 1], (1, 0, 2, 3))    # (C-1, N, H, W)
            dsums = _dice_partials(preds_rest, gts_rest, mask)            # (C-1, 2)
            dice_loss = dice_loss + jnp.sum(
                1.0 - 2.0 * dsums[:, 0] / (dsums[:, 1] + self.eps))

        metrics['seg_loss'] = dice_loss
        loss = dice_loss * self.dice_scale + bce_loss * self.bce_scale
        return loss, metrics

    __call__ = forward


# ----------------------------------------------------------------------------
# Demo
# ----------------------------------------------------------------------------
if __name__ == "__main__":
    key = jax.random.PRNGKey(0)
    N, C, H, W = 2, 4, 16, 16                      # NCHW, as in the PyTorch module

    k1, k2, k3, k4 = jax.random.split(key, 4)
    pred = {
        'binary': jax.nn.sigmoid(jax.random.normal(k1, (N, C, H, W), jnp.float32)),
    }
    batch = {
        'gt': (jax.random.uniform(k2, (N, 1, H, W)) > 0.5).astype(jnp.float32),
        'mask': (jax.random.uniform(k3, (N, H, W)) > 0.1).astype(jnp.float32),
        'seg_gts': (jax.random.uniform(k4, (N, C - 1, H, W)) > 0.5).astype(jnp.float32),
    }

    loss_mod = L1BalanceSegLoss()
    loss, metrics = loss_mod(pred, batch)
    jax.block_until_ready(loss)
    for v in metrics.values():
        jax.block_until_ready(v)
    print("KERNEL_OK")
</pallas_src>

<mosaic_0001>
module attributes {stable_mosaic.version = 11 : i64} {
  func.func @_bce_dice_kernel(%arg0: i32, %arg1: i32, %arg2: memref<8x128xf32, #tpu.memory_space<vmem>>, %arg3: memref<8x128xf32, #tpu.memory_space<vmem>>, %arg4: memref<8x128xf32, #tpu.memory_space<vmem>>, %arg5: memref<8x128xf32, #tpu.memory_space<vmem>>, %arg6: memref<1x5x8x128xf32, #tpu.memory_space<vmem>>) attributes {dimension_semantics = [#tpu.dimension_semantics<parallel>, #tpu.dimension_semantics<arbitrary>], iteration_bounds = array<i64: 1, 1>, scalar_prefetch = 0 : i64, scratch_operands = 0 : i64, tpu.core_type = #tpu.core_type<tc>, window_params = [{transform_indices = @transform_0, window_bounds = array<i64: 8, 128>}, {transform_indices = @transform_1, window_bounds = array<i64: 8, 128>}, {transform_indices = @transform_2, window_bounds = array<i64: 8, 128>}, {transform_indices = @transform_3, window_bounds = array<i64: 8, 128>}, {transform_indices = @transform_4, window_bounds = array<i64: 1, 5, 8, 128>}]} {
    %c0_i32 = arith.constant 0 : i32
    %0 = arith.cmpi eq, %arg1, %c0_i32 : i32
    %1 = arith.extui %0 : i1 to i32
    %c0_i32_0 = arith.constant 0 : i32
    %2 = arith.cmpi ne, %1, %c0_i32_0 : i32
    scf.if %2 {
      %cst_48 = arith.constant 0.000000e+00 : f32
      %55 = vector.broadcast %cst_48 : f32 to vector<5x8x128xf32>
      %c0_49 = arith.constant 0 : index
      %c0_50 = arith.constant 0 : index
      %c0_51 = arith.constant 0 : index
      %c0_52 = arith.constant 0 : index
      %56 = vector.load %arg6[%c0_49, %c0_50, %c0_51, %c0_52] : memref<1x5x8x128xf32, #tpu.memory_space<vmem>>, vector<1x5x8x128xf32>
      %57 = vector.shape_cast %56 : vector<1x5x8x128xf32> to vector<5x8x128xf32>
      %58 = vector.shape_cast %55 : vector<5x8x128xf32> to vector<1x5x8x128xf32>
      tpu.vector_store %arg6[%c0_49, %c0_50, %c0_51, %c0_52], %58 {strides = array<i32>} : memref<1x5x8x128xf32, #tpu.memory_space<vmem>>, vector<1x5x8x128xf32>,
    } else {
    }
    %c0 = arith.constant 0 : index
    %c0_1 = arith.constant 0 : index
    %3 = vector.load %arg2[%c0, %c0_1] : memref<8x128xf32, #tpu.memory_space<vmem>>, vector<8x128xf32>
    %c0_2 = arith.constant 0 : index
    %c0_3 = arith.constant 0 : index
    %4 = vector.load %arg3[%c0_2, %c0_3] : memref<8x128xf32, #tpu.memory_space<vmem>>, vector<8x128xf32>
    %c0_4 = arith.constant 0 : index
    %c0_5 = arith.constant 0 : index
    %5 = vector.load %arg4[%c0_4, %c0_5] : memref<8x128xf32, #tpu.memory_space<vmem>>, vector<8x128xf32>
    %cst = arith.constant 9.99999997E-7 : f32
    %cst_6 = arith.constant 0.999998986 : f32
    %6 = vector.broadcast %cst : f32 to vector<8x128xf32>
    %7 = arith.maximumf %6, %3 : vector<8x128xf32>
    %8 = vector.broadcast %cst_6 : f32 to vector<8x128xf32>
    %9 = arith.minimumf %8, %7 : vector<8x128xf32>
    %cst_7 = arith.constant 5.000000e-01 : f32
    %10 = vector.broadcast %cst_7 : f32 to vector<8x128xf32>
    %11 = arith.cmpf ogt, %4, %10 : vector<8x128xf32>
    %cst_8 = arith.constant 1.000000e+00 : f32
    %12 = vector.broadcast %cst_8 : f32 to vector<8x128xf32>
    %13 = arith.subf %12, %9 : vector<8x128xf32>
    %14 = arith.select %11, %9, %13 : vector<8x128xi1>, vector<8x128xf32>
    %15 = math.log %14 : vector<8x128xf32>
    %cst_9 = arith.constant 0.000000e+00 : f32
    %16 = vector.broadcast %cst_9 : f32 to vector<8x128xf32>
    %17 = arith.subf %16, %15 : vector<8x128xf32>
    %18 = arith.mulf %4, %5 : vector<8x128xf32>
    %19 = arith.subf %5, %18 : vector<8x128xf32>
    %20 = arith.mulf %17, %19 : vector<8x128xf32>
    %c0_10 = arith.constant 0 : index
    %c0_11 = arith.constant 0 : index
    %21 = vector.load %arg5[%c0_10, %c0_11] : memref<8x128xf32, #tpu.memory_space<vmem>>, vector<8x128xf32>
    tpu.vector_store %arg5[%c0_10, %c0_11], %20 {strides = array<i32>} : memref<8x128xf32, #tpu.memory_space<vmem>>, vector<8x128xf32>,
    %c0_12 = arith.constant 0 : index
    %c0_13 = arith.constant 0 : index
    %c0_14 = arith.constant 0 : index
    %c0_15 = arith.constant 0 : index
    %22 = vector.load %arg6[%c0_12, %c0_13, %c0_14, %c0_15] : memref<1x5x8x128xf32, #tpu.memory_space<vmem>>, vector<1x1x8x128xf32>
    %23 = vector.shape_cast %22 : vector<1x1x8x128xf32> to vector<8x128xf32>
    %24 = arith.mulf %17, %18 : vector<8x128xf32>
    %25 = arith.addf %23, %24 : vector<8x128xf32>
    %c0_16 = arith.constant 0 : index
    %c0_17 = arith.constant 0 : index
    %c0_18 = arith.constant 0 : index
    %c0_19 = arith.constant 0 : index
    %26 = vector.load %arg6[%c0_16, %c0_17, %c0_18, %c0_19] : memref<1x5x8x128xf32, #tpu.memory_space<vmem>>, vector<1x1x8x128xf32>
    %27 = vector.shape_cast %26 : vector<1x1x8x128xf32> to vector<8x128xf32>
    %28 = vector.shape_cast %25 : vector<8x128xf32> to vector<1x1x8x128xf32>
    tpu.vector_store %arg6[%c0_16, %c0_17, %c0_18, %c0_19], %28 {strides = array<i32>} : memref<1x5x8x128xf32, #tpu.memory_space<vmem>>, vector<1x1x8x128xf32>,
    %c0_20 = arith.constant 0 : index
    %c1 = arith.constant 1 : index
    %c0_21 = arith.constant 0 : index
    %c0_22 = arith.constant 0 : index
    %29 = vector.load %arg6[%c0_20, %c1, %c0_21, %c0_22] : memref<1x5x8x128xf32, #tpu.memory_space<vmem>>, vector<1x1x8x128xf32>
    %30 = vector.shape_cast %29 : vector<1x1x8x128xf32> to vector<8x128xf32>
    %31 = arith.addf %30, %18 : vector<8x128xf32>
    %c0_23 = arith.constant 0 : index
    %c1_24 = arith.constant 1 : index
    %c0_25 = arith.constant 0 : index
    %c0_26 = arith.constant 0 : index
    %32 = vector.load %arg6[%c0_23, %c1_24, %c0_25, %c0_26] : memref<1x5x8x128xf32, #tpu.memory_space<vmem>>, vector<1x1x8x128xf32>
    %33 = vector.shape_cast %32 : vector<1x1x8x128xf32> to vector<8x128xf32>
    %34 = vector.shape_cast %31 : vector<8x128xf32> to vector<1x1x8x128xf32>
    tpu.vector_store %arg6[%c0_23, %c1_24, %c0_25, %c0_26], %34 {strides = array<i32>} : memref<1x5x8x128xf32, #tpu.memory_space<vmem>>, vector<1x1x8x128xf32>,
    %c0_27 = arith.constant 0 : index
    %c2 = arith.constant 2 : index
    %c0_28 = arith.constant 0 : index
    %c0_29 = arith.constant 0 : index
    %35 = vector.load %arg6[%c0_27, %c2, %c0_28, %c0_29] : memref<1x5x8x128xf32, #tpu.memory_space<vmem>>, vector<1x1x8x128xf32>
    %36 = vector.shape_cast %35 : vector<1x1x8x128xf32> to vector<8x128xf32>
    %37 = arith.addf %36, %5 : vector<8x128xf32>
    %c0_30 = arith.constant 0 : index
    %c2_31 = arith.constant 2 : index
    %c0_32 = arith.constant 0 : index
    %c0_33 = arith.constant 0 : index
    %38 = vector.load %arg6[%c0_30, %c2_31, %c0_32, %c0_33] : memref<1x5x8x128xf32, #tpu.memory_space<vmem>>, vector<1x1x8x128xf32>
    %39 = vector.shape_cast %38 : vector<1x1x8x128xf32> to vector<8x128xf32>
    %40 = vector.shape_cast %37 : vector<8x128xf32> to vector<1x1x8x128xf32>
    tpu.vector_store %arg6[%c0_30, %c2_31, %c0_32, %c0_33], %40 {strides = array<i32>} : memref<1x5x8x128xf32, #tpu.memory_space<vmem>>, vector<1x1x8x128xf32>,
    %c0_34 = arith.constant 0 : index
    %c3 = arith.constant 3 : index
    %c0_35 = arith.constant 0 : index
    %c0_36 = arith.constant 0 : index
    %41 = vector.load %arg6[%c0_34, %c3, %c0_35, %c0_36] : memref<1x5x8x128xf32, #tpu.memory_space<vmem>>, vector<1x1x8x128xf32>
    %42 = vector.shape_cast %41 : vector<1x1x8x128xf32> to vector<8x128xf32>
    %43 = arith.mulf %3, %18 : vector<8x128xf32>
    %44 = arith.addf %42, %43 : vector<8x128xf32>
    %c0_37 = arith.constant 0 : index
    %c3_38 = arith.constant 3 : index
    %c0_39 = arith.constant 0 : index
    %c0_40 = arith.constant 0 : index
    %45 = vector.load %arg6[%c0_37, %c3_38, %c0_39, %c0_40] : memref<1x5x8x128xf32, #tpu.memory_space<vmem>>, vector<1x1x8x128xf32>
    %46 = vector.shape_cast %45 : vector<1x1x8x128xf32> to vector<8x128xf32>
    %47 = vector.shape_cast %44 : vector<8x128xf32> to vector<1x1x8x128xf32>
    tpu.vector_store %arg6[%c0_37, %c3_38, %c0_39, %c0_40], %47 {strides = array<i32>} : memref<1x5x8x128xf32, #tpu.memory_space<vmem>>, vector<1x1x8x128xf32>,
    %c0_41 = arith.constant 0 : index
    %c4 = arith.constant 4 : index
    %c0_42 = arith.constant 0 : index
    %c0_43 = arith.constant 0 : index
    %48 = vector.load %arg6[%c0_41, %c4, %c0_42, %c0_43] : memref<1x5x8x128xf32, #tpu.memory_space<vmem>>, vector<1x1x8x128xf32>
    %49 = vector.shape_cast %48 : vector<1x1x8x128xf32> to vector<8x128xf32>
    %50 = arith.mulf %3, %5 : vector<8x128xf32>
    %51 = arith.addf %49, %50 : vector<8x128xf32>
    %c0_44 = arith.constant 0 : index
    %c4_45 = arith.constant 4 : index
    %c0_46 = arith.constant 0 : index
    %c0_47 = arith.constant 0 : index
    %52 = vector.load %arg6[%c0_44, %c4_45, %c0_46, %c0_47] : memref<1x5x8x128xf32, #tpu.memory_space<vmem>>, vector<1x1x8x128xf32>
    %53 = vector.shape_cast %52 : vector<1x1x8x128xf32> to vector<8x128xf32>
    %54 = vector.shape_cast %51 : vector<8x128xf32> to vector<1x1x8x128xf32>
    tpu.vector_store %arg6[%c0_44, %c4_45, %c0_46, %c0_47], %54 {strides = array<i32>} : memref<1x5x8x128xf32, #tpu.memory_space<vmem>>, vector<1x1x8x128xf32>,
    return
  }
  func.func @transform_0(%arg0: i32, %arg1: i32) -> (i32, i32) {
    %c1_i32 = arith.constant 1 : i32
    %0 = arith.muli %arg0, %c1_i32 : i32
    %1 = arith.addi %0, %arg1 : i32
    %c0_i32 = arith.constant 0 : i32
    %c0_i32_0 = arith.constant 0 : i32
    return %1, %c0_i32 : i32, i32
  }
  func.func @transform_1(%arg0: i32, %arg1: i32) -> (i32, i32) {
    %c1_i32 = arith.constant 1 : i32
    %0 = arith.muli %arg0, %c1_i32 : i32
    %1 = arith.addi %0, %arg1 : i32
    %c0_i32 = arith.constant 0 : i32
    %c0_i32_0 = arith.constant 0 : i32
    return %1, %c0_i32 : i32, i32
  }
  func.func @transform_2(%arg0: i32, %arg1: i32) -> (i32, i32) {
    %c1_i32 = arith.constant 1 : i32
    %0 = arith.muli %arg0, %c1_i32 : i32
    %1 = arith.addi %0, %arg1 : i32
    %c0_i32 = arith.constant 0 : i32
    %c0_i32_0 = arith.constant 0 : i32
    return %1, %c0_i32 : i32, i32
  }
  func.func @transform_3(%arg0: i32, %arg1: i32) -> (i32, i32) {
    %c1_i32 = arith.constant 1 : i32
    %0 = arith.muli %arg0, %c1_i32 : i32
    %1 = arith.addi %0, %arg1 : i32
    %c0_i32 = arith.constant 0 : i32
    %c0_i32_0 = arith.constant 0 : i32
    return %1, %c0_i32 : i32, i32
  }
  func.func @transform_4(%arg0: i32, %arg1: i32) -> (i32, i32, i32, i32) {
    %c0_i32 = arith.constant 0 : i32
    %c0_i32_0 = arith.constant 0 : i32
    %c0_i32_1 = arith.constant 0 : i32
    %c0_i32_2 = arith.constant 0 : i32
    return %arg0, %c0_i32, %c0_i32_0, %c0_i32_1 : i32, i32, i32, i32
  }
}

</mosaic_0001>

<bundles_post_ra>
// kernel: tpu_custom_call.1
= control target key start
LH: loop header
LB: loop body
LE: loop exit
PB: predicated region body
PF: predicated region fallthrough
CT: control target
= control target key end

     0   :  { %10 = vsyncpa [#allocation3], 0  ;;  %s374_s0 = inlined_call_operand.hbm [shape: f32[8,128], index: 0, kind: input, shape index: {}]   ;;  %s375_s1 = inlined_call_operand.hbm [shape: f32[8,128], index: 1, kind: input, shape index: {}]   ;;  %s376_s2 = inlined_call_operand.hbm [shape: f32[8,128], index: 2, kind: input, shape index: {}]   ;;  %s377_s3 = inlined_call_operand.hbm [shape: f32[8,128], index: 3, kind: output, shape index: {0}]   ;;  %s378_s4 = inlined_call_operand.hbm [shape: f32[1,5,8,128], index: 4, kind: output, shape index: {1}]  }
   0x1   :  { %11 = vsyncpa [#allocation6], 0 }
   0x2   :  { %12 = vsyncpa [#allocation4], 0 }
   0x3   :  { %13 = vsyncpa [#allocation10], 0  ;;  %s275_s15 = smov [#allocation5]   ;;  %s276_s17 = smov [#allocation2]  }
   0x4   :  { %s36_s16 = sshll.u32 %s275_s15, 4  ;;  %s23_s18 = sshll.u32 %s276_s17, 4  ;;  %s37_s16 = int_to_ptr.vmem [resolvable:$true] %s36_s16  ;;  %s24_s18 = int_to_ptr.vmem [resolvable:$true] %s23_s18 }
   0x5   :  { %s157_s21 = scalar_lea.hbm %s375_s1, 128 }
   0x6   :  { %p158_p0 = scmp.ne.s32.totalorder %s375_s1, %s157_s21  ;;  %p161_p1 = scmp.lt.u32.totalorder %s157_s21, %s375_s1 }
   0x8   :  { %p163_p2 = pnand %p161_p1, %p158_p0 }
   0xa   :  { %166 = shalt.err (!%p163_p2)
}
   0xb   :  { %s167_s26 = scalar_lea.vmem %s37_s16, 128  ;;  %p172_p4 = scmp.lt.s32.totalorder %s37_s16, %s37_s16 }
   0xc   :  { %p168_p3 = scmp.ne.s32.totalorder %s37_s16, %s167_s26  ;;  %p173_p5 = scmp.lt.s32.totalorder %s167_s26, %s167_s26 }
   0xe   :  { %p174_p6 = por %p173_p5, %p172_p4 }
  0x10   :  { %p175_p7 = pnand %p174_p6, %p168_p3 }
  0x12   :  { %178 = shalt.err (!%p175_p7)
}
  0x13   :  { %39 = dma.hbm_to_vmem [thread:$0]  %s375_s1, 128, %s37_s16, [#allocation6]  }
  0x14   :  { %s179_s5 = scalar_lea.hbm %s374_s0, 128 }
  0x15   :  { %p180_p8 = scmp.ne.s32.totalorder %s374_s0, %s179_s5  ;;  %p183_p9 = scmp.lt.u32.totalorder %s179_s5, %s374_s0 }
  0x17   :  { %p185_p10 = pnand %p183_p9, %p180_p8 }
  0x19   :  { %188 = shalt.err (!%p185_p10)
}
  0x1a   :  { %s189_s10 = scalar_lea.vmem %s24_s18, 128  ;;  %p194_p12 = scmp.lt.s32.totalorder %s24_s18, %s24_s18 }
  0x1b   :  { %p190_p11 = scmp.ne.s32.totalorder %s24_s18, %s189_s10  ;;  %p195_p13 = scmp.lt.s32.totalorder %s189_s10, %s189_s10 }
  0x1d   :  { %p196_p0 = por %p195_p13, %p194_p12 }
  0x1f   :  { %p197_p1 = pnand %p196_p0, %p190_p11 }
  0x21   :  { %200 = shalt.err (!%p197_p1)
}
  0x22   :  { %26 = dma.hbm_to_vmem [thread:$0]  %s374_s0, 128, %s24_s18, [#allocation3]  }
  0x23   :  { %s277_s12 = smov [#allocation7]   ;;  %s201_s16 = scalar_lea.hbm %s376_s2, 128 }
  0x24   :  { %s49_s13 = sshll.u32 %s277_s12, 4  ;;  %p202_p2 = scmp.ne.s32.totalorder %s376_s2, %s201_s16  ;;  %s50_s13 = int_to_ptr.vmem [resolvable:$true] %s49_s13 }
  0x25   :  { %p205_p3 = scmp.lt.u32.totalorder %s201_s16, %s376_s2 }
  0x27   :  { %p207_p4 = pnand %p205_p3, %p202_p2 }
  0x29   :  { %210 = shalt.err (!%p207_p4)
}
  0x2a   :  { %s211_s22 = scalar_lea.vmem %s50_s13, 128  ;;  %p216_p6 = scmp.lt.s32.totalorder %s50_s13, %s50_s13 }
  0x2b   :  { %p212_p5 = scmp.ne.s32.totalorder %s50_s13, %s211_s22  ;;  %p217_p7 = scmp.lt.s32.totalorder %s211_s22, %s211_s22 }
  0x2d   :  { %p218_p8 = por %p217_p7, %p216_p6 }
  0x2f   :  { %p219_p9 = pnand %p218_p8, %p212_p5 }
  0x31   :  { %222 = shalt.err (!%p219_p9)
}
  0x32   :  { %52 = dma.hbm_to_vmem [thread:$0]  %s376_s2, 128, %s50_s13, [#allocation6]  }
  0x33   :  { %267 = dma.done.wait [#allocation3], 128  }
  0x34   :  { %268 = vsyncadd [#allocation3], 4294967168 }
  0x35   :  { %269 = dma.done.wait [#allocation6], 256  }
  0x36   :  { %270 = vsyncadd [#allocation6], 4294967040  ;;  %v75_v0 = vld [vmem:[#allocation2] sm:$0xff]  ;;  %v76_v1 = vld [vmem:[#allocation5] sm:$0xff]  ;;  %s278_s2 = smov [#allocation8]   ;;  %s279_s24 = smov [#allocation9]  }
  0x37   :  { %v77_v2 = vld [vmem:[#allocation7] sm:$0xff]  ;;  %v78_v3 = vmax.f32 %v75_v0, 1e-06  ;;  %vm80_vm0 = vcmp.gt.f32.partialorder %v76_v1, 0.5  ;;  %s121_s23 = sshll.u32 %s278_s2, 4  ;;  %s130_s25 = sshll.u32 %s279_s24, 4  ;;  %s122_s23 = int_to_ptr.vmem [resolvable:$true] %s121_s23  ;;  %s343_s25 = int_to_ptr.vmem [resolvable:$true] %s130_s25 }
  0x38   :  { %v86_v4 = vmul.f32 %v77_v2, %v76_v1  ;;  %v109_v5 = vmul.f32 %v77_v2, %v75_v0  ;;  %101 = vst [vmem:[#allocation9 + $0x10] sm:$0xff] %v77_v2  ;;  %s223_s26 = scalar_lea.vmem %s122_s23, 128  ;;  %p228_p11 = scmp.lt.s32.totalorder %s122_s23, %s122_s23 }
  0x39   :  { %v79_v6 = vmin.f32 %v78_v3, 0.999999  ;;  %p224_p10 = scmp.ne.s32.totalorder %s122_s23, %s223_s26  ;;  %p229_p12 = scmp.lt.s32.totalorder %s223_s26, %s223_s26 }
  0x3a   :  { %v104_v7 = vmul.f32 %v86_v4, %v75_v0  ;;  %97 = vst [vmem:[#allocation9 + $0x8] sm:$0xff] %v86_v4  ;;  %111 = vst [vmem:[#allocation9 + $0x20] sm:$0xff] %v109_v5  ;;  %v87_v12 = vsub.f32 %v77_v2, %v86_v4 }
  0x3b   :  { %v81_v8 = vsub.f32 1.0, %v79_v6  ;;  %p230_p13 = por %p229_p12, %p228_p11 }
  0x3c   :  { %106 = vst [vmem:[#allocation9 + $0x18] sm:$0xff] %v104_v7 }
  0x3d   :  { %v82_v9 = vsel %vm80_vm0, %v79_v6, %v81_v8  ;;  %p231_p0 = pnand %p230_p13, %p224_p10 }
  0x3e   :  { %155 = vlog2.f32 %v82_v9 }
  0x48   :  { %v156_v10 = vpop.eup %155 }
  0x49   :  { %v84_v11 = vmul.f32 0.6931472, %v156_v10 }
  0x4b   :  { %v85_v13 = vsub.f32 0.0, %v84_v11 }
  0x4d   :  { %v88_v14 = vmul.f32 %v87_v12, %v85_v13  ;;  %v91_v15 = vmul.f32 %v86_v4, %v85_v13 }
  0x4f   :  { %89 = vst [vmem:[#allocation8] sm:$0xff] %v88_v14 }
  0x50   :  { %234 = shalt.err (!%p231_p0)
}
  0x51   :  { %s235_s29 = scalar_lea.hbm %s377_s3, 128 }
  0x52   :  { %p236_p1 = scmp.ne.s32.totalorder %s377_s3, %s235_s29  ;;  %p239_p2 = scmp.lt.u32.totalorder %s235_s29, %s377_s3 }
  0x54   :  { %p241_p3 = pnand %p239_p2, %p236_p1 }
  0x56   :  { %244 = shalt.err (!%p241_p3)
}
  0x57   :  { %124 = dma.vmem_to_hbm [thread:$0]  %s122_s23, 128, %s377_s3, [#allocation4]   ;;  %93 = vst [vmem:[#allocation9] sm:$0xff] %v91_v15 }
  0x58   :  { %s245_s10 = scalar_lea.vmem %s343_s25, 640  ;;  %p250_p5 = scmp.lt.s32.totalorder %s343_s25, %s343_s25 }
  0x59   :  { %p246_p4 = scmp.ne.s32.totalorder %s343_s25, %s245_s10  ;;  %p251_p6 = scmp.lt.s32.totalorder %s245_s10, %s245_s10 }
  0x5b   :  { %p252_p7 = por %p251_p6, %p250_p5 }
  0x5d   :  { %p253_p8 = pnand %p252_p7, %p246_p4 }
  0x5f   :  { %256 = shalt.err (!%p253_p8)
}
  0x60   :  { %s257_s12 = scalar_lea.hbm %s378_s4, 640 }
  0x61   :  { %p258_p9 = scmp.ne.s32.totalorder %s378_s4, %s257_s12  ;;  %p261_p10 = scmp.lt.u32.totalorder %s257_s12, %s378_s4 }
  0x63   :  { %p263_p11 = pnand %p261_p10, %p258_p9 }
  0x65   :  { %266 = shalt.err (!%p263_p11)
}
  0x66   :  { %s280_s3 = smov 128   ;;  %s281_s17 = smov 8  }
  0x67   :  { %136 = dma.vmem_to_hbm [thread:$0]  %s343_s25, 640, %s378_s4, [#allocation10], %s280_s3, %s280_s3, %s281_s17  }
  0x68   :  { %271 = dma.done.wait [#allocation4], 128  }
  0x69   :  { %272 = vsyncadd [#allocation4], 4294967168 }
  0x6a   :  { %273 = dma.done.wait [#allocation10], 640  }
  0x6b   :  { %274 = vsyncadd [#allocation10], 4294966656 }
  0x6c   :  { %143 = vsyncpa [#allocation3], 1 }
  0x6d   :  { %144 = vsyncpa [#allocation6], 1 }
  0x6e   :  { %145 = vsyncpa [#allocation4], 1 }
  0x6f   :  { %146 = vsyncpa [#allocation10], 1 }

</bundles_post_ra>
